<compile_context>
chip_gen: v5e
topology: v5e:2x2
jax: 0.10.0
libtpu: 0.0.40
codegen_flags: <defaults>
</compile_context>

<pallas_src>
import jax
import jax.numpy as jnp
from jax import lax
from jax.experimental import pallas as pl
from jax.experimental.pallas import tpu as pltpu


def _round_up(x, m):
    return (x + m - 1) // m * m


def ensemble_kernel(x_ref, w_enc_ref, w_dec_ref, b_dec_ref, rel_ref, out_ref, acc_ref):
    k = pl.program_id(1)

    # ---- init f32 accumulator on first K step ----
    @pl.when(k == 0)
    def _init():
        acc_ref[...] = jnp.zeros_like(acc_ref)

    # ---- K-tiled encoder matmul: bf16 operands, f32 MXU accumulation ----
    acc_ref[...] += jnp.dot(
        x_ref[...], w_enc_ref[...], preferred_element_type=jnp.float32
    )

    # ---- finalize: tanh + decoder + postprocess (f32, VPU/EUP) ----
    @pl.when(k == pl.num_programs(1) - 1)
    def _finalize():
        BM, C = out_ref.shape

        # encoder stand-in nonlinearity
        feat = jnp.tanh(acc_ref[...])                                   # [BM, F] f32

        # decoder: tiny [F, C] matmul kept in f32
        pred = (
            jnp.dot(feat, w_dec_ref[...], preferred_element_type=jnp.float32)
            + b_dec_ref[...]
        )                                                               # [BM, C]

        # relation clamp (constraint(0.1, 1)); local copy only (see TODO above)
        rel = jnp.clip(rel_ref[...], 0.1, 1.0)                          # [C, C]

        # product[b,i,j] = pred[b,i] * pred[b,j] * rel[i,j];  maxi = max_j
        # (C is tiny, so the 3-D temp is a handful of vregs per B-tile.)
        prod = pred[:, :, None] * (pred[:, None, :] * rel[None, :, :])  # [BM, C, C]
        maxi = jnp.max(prod, axis=2)                                    # [BM, C]

        # idx = argmax(maxi, dim=1)  (first maximal index)
        iota = lax.broadcasted_iota(jnp.int32, (BM, C), 1)              # [BM, C]
        row_max = jnp.max(maxi, axis=1, keepdims=True)                  # [BM, 1]
        idx = jnp.min(jnp.where(maxi >= row_max, iota, C), axis=1)      # [BM]

        # relation[idx, :] via one-hot + VPU reduction (no MXU pass)
        onehot = (iota == idx[:, None]).astype(jnp.float32)             # [BM, C]
        sel = jnp.sum(onehot[:, :, None] * rel[None, :, :], axis=1)     # [BM, C]

        # pred * relation[idx, :]; torch's conditional clamp == unconditional clamp
        out_ref[...] = jnp.clip(pred * sel, 0.0, 1.0)


def ensemble_forward(x, w_enc, w_dec, b_dec, relation, *, block_b=128, block_k=512):
    B = x.shape[0]
    D_in, F = w_enc.shape
    C = relation.shape[0]

    x_flat = x.reshape(B, -1).astype(jnp.float32)                       # NCHW -> [B, D_in]
    assert x_flat.shape[1] == D_in

    # ---- tile sizes: B padded to sublane multiple, K tiled for streaming ----
    BM = min(block_b, _round_up(B, 8))
    TK = min(block_k, _round_up(D_in, 128))
    Bp = _round_up(B, BM)
    Kp = _round_up(D_in, TK)

    # ---- pad & cast matmul operands to bf16 (zero-padding is matmul-neutral) ----
    x_bf = jnp.pad(x_flat, ((0, Bp - B), (0, Kp - D_in))).astype(jnp.bfloat16)
    w_enc_bf = jnp.pad(w_enc, ((0, Kp - D_in), (0, 0))).astype(jnp.bfloat16)
    w_dec_f = w_dec.astype(jnp.float32)
    b_dec_f = b_dec.astype(jnp.float32)
    rel_f = relation.astype(jnp.float32)

    grid = (Bp // BM, Kp // TK)

    # VMEM budget: double-buffered x & w_enc tiles (bf16) + f32 accumulator + small tails.
    est_bytes = (
        2 * BM * TK * 2          # x tiles
        + 2 * TK * F * 2         # w_enc tiles
        + BM * F * 4             # accumulator scratch
        + 2 * BM * C * 4         # output
        + F * C * 4 + C * 4 + C * C * 4
    )
    vmem_limit = min(32 * 1024 * 1024, max(8 * 1024 * 1024, 4 * est_bytes))

    out_padded = pl.pallas_call(
        ensemble_kernel,
        out_shape=jax.ShapeDtypeStruct((Bp, C), jnp.float32),
        grid_spec=pltpu.PrefetchScalarGridSpec(
            num_scalar_prefetch=0,
            grid=grid,
            in_specs=[
                pl.BlockSpec((BM, TK), lambda b, k: (b, k)),   # x
                pl.BlockSpec((TK, F), lambda b, k: (k, 0)),    # w_enc (streamed over K)
                pl.BlockSpec((F, C), lambda b, k: (0, 0)),     # w_dec (small, resident)
                pl.BlockSpec((1, C), lambda b, k: (0, 0)),     # b_dec
                pl.BlockSpec((C, C), lambda b, k: (0, 0)),     # relation
            ],
            out_specs=pl.BlockSpec((BM, C), lambda b, k: (b, 0)),
            scratch_shapes=[pltpu.VMEM((BM, F), jnp.float32)],
        ),
        compiler_params=pltpu.CompilerParams(
            dimension_semantics=("parallel", "arbitrary"),
            vmem_limit_bytes=vmem_limit,
        ),
    )(x_bf, w_enc_bf, w_dec_f, b_dec_f, rel_f)

    return out_padded[:B]


def ensemble_reference(x, w_enc, w_dec, b_dec, relation):
    """Pure-JAX reference mirroring the PyTorch forward (bf16 matmul operands
    to match the kernel's operand precision; f32 accumulation & postprocess)."""
    B = x.shape[0]
    x_flat = x.reshape(B, -1).astype(jnp.float32)
    feat = jnp.tanh(
        jnp.dot(x_flat.astype(jnp.bfloat16), w_enc.astype(jnp.bfloat16),
                preferred_element_type=jnp.float32)
    )
    pred = jnp.dot(feat, w_dec, preferred_element_type=jnp.float32) + b_dec
    rel = jnp.clip(relation, 0.1, 1.0)
    product = pred[:, :, None] * pred[:, None, :] * rel[None]
    maxi = product.max(axis=2)
    idx = jnp.argmax(maxi, axis=1)
    pred = pred * rel[idx, :]
    return jnp.clip(pred, 0.0, 1.0)


if __name__ == "__main__":
    # Small shapes consistent with the module's forward.
    B, C_in, H, W = 2, 4, 16, 16        # input image (NCHW)
    n_last_blocks, embed_dim = 4, 32    # -> feature dim F = 128
    F = n_last_blocks * embed_dim
    n_classes = 8                       # relation is [n_classes, n_classes]
    D_in = C_in * H * W

    key = jax.random.PRNGKey(0)
    k_x, k_we, k_wd, k_b, k_rel = jax.random.split(key, 5)

    x = jax.random.normal(k_x, (B, C_in, H, W), dtype=jnp.float32)
    w_enc = jax.random.normal(k_we, (D_in, F), dtype=jnp.float32) * (1.0 / D_in**0.5)
    w_dec = jax.random.normal(k_wd, (F, n_classes), dtype=jnp.float32) * (1.0 / F**0.5)
    b_dec = jax.random.normal(k_b, (1, n_classes), dtype=jnp.float32) * 0.1
    # relation parameter: uniform in [0, 1.5] so the 0.1..1 clamp is exercised.
    relation = jax.random.uniform(k_rel, (n_classes, n_classes),
                                  dtype=jnp.float32, minval=0.0, maxval=1.5)

    out = ensemble_forward(x, w_enc, w_dec, b_dec, relation)
    out = jax.block_until_ready(out)

    ref = ensemble_reference(x, w_enc, w_dec, b_dec, relation)
    assert out.shape == (B, n_classes)
    assert jnp.allclose(out, ref, rtol=5e-4, atol=5e-4), (out, ref)

    print("KERNEL_OK")
</pallas_src>

<mosaic_0001>
module attributes {stable_mosaic.version = 11 : i64} {
  func.func @ensemble_kernel(%arg0: i32, %arg1: i32, %arg2: memref<8x512xbf16, #tpu.memory_space<vmem>>, %arg3: memref<512x128xbf16, #tpu.memory_space<vmem>>, %arg4: memref<128x8xf32, #tpu.memory_space<vmem>>, %arg5: memref<1x8xf32, #tpu.memory_space<vmem>>, %arg6: memref<8x8xf32, #tpu.memory_space<vmem>>, %arg7: memref<8x8xf32, #tpu.memory_space<vmem>>, %arg8: memref<8x128xf32, #tpu.memory_space<vmem>>) attributes {dimension_semantics = [#tpu.dimension_semantics<parallel>, #tpu.dimension_semantics<arbitrary>], iteration_bounds = array<i64: 1, 2>, scalar_prefetch = 0 : i64, scratch_operands = 1 : i64, tpu.core_type = #tpu.core_type<tc>, window_params = [{transform_indices = @transform_0, window_bounds = array<i64: 8, 512>}, {transform_indices = @transform_1, window_bounds = array<i64: 512, 128>}, {pipeline_mode = #tpu.pipeline_mode<synchronous>, transform_indices = @transform_2, window_bounds = array<i64: 128, 8>}, {pipeline_mode = #tpu.pipeline_mode<synchronous>, transform_indices = @transform_3, window_bounds = array<i64: 1, 8>}, {pipeline_mode = #tpu.pipeline_mode<synchronous>, transform_indices = @transform_4, window_bounds = array<i64: 8, 8>}, {transform_indices = @transform_5, window_bounds = array<i64: 8, 8>}]} {
    %c0_i32 = arith.constant 0 : i32
    %0 = arith.cmpi eq, %arg1, %c0_i32 : i32
    %1 = arith.extui %0 : i1 to i32
    %c0_i32_0 = arith.constant 0 : i32
    %2 = arith.cmpi ne, %1, %c0_i32_0 : i32
    scf.if %2 {
      %cst_9 = arith.constant 0.000000e+00 : f32
      %12 = vector.broadcast %cst_9 : f32 to vector<8x128xf32>
      %c0_10 = arith.constant 0 : index
      %c0_11 = arith.constant 0 : index
      %13 = vector.load %arg8[%c0_10, %c0_11] : memref<8x128xf32, #tpu.memory_space<vmem>>, vector<8x128xf32>
      tpu.vector_store %arg8[%c0_10, %c0_11], %12 {strides = array<i32>} : memref<8x128xf32, #tpu.memory_space<vmem>>, vector<8x128xf32>,
    } else {
    }
    %c0 = arith.constant 0 : index
    %c0_1 = arith.constant 0 : index
    %3 = vector.load %arg8[%c0, %c0_1] : memref<8x128xf32, #tpu.memory_space<vmem>>, vector<8x128xf32>
    %c0_2 = arith.constant 0 : index
    %c0_3 = arith.constant 0 : index
    %4 = vector.load %arg2[%c0_2, %c0_3] : memref<8x512xbf16, #tpu.memory_space<vmem>>, vector<8x512xbf16>
    %c0_4 = arith.constant 0 : index
    %c0_5 = arith.constant 0 : index
    %5 = vector.load %arg3[%c0_4, %c0_5] : memref<512x128xbf16, #tpu.memory_space<vmem>>, vector<512x128xbf16>
    %cst = arith.constant dense<0.000000e+00> : vector<8x128xf32>
    %6 = tpu.matmul %4, %5, %cst {dimension_numbers = #tpu.dot_dimension_numbers<[1], [0], [0], [1], [0, 0, 1, 1], [], []>} : vector<8x512xbf16>, vector<512x128xbf16>, vector<8x128xf32> -> vector<8x128xf32>
    %7 = arith.addf %3, %6 : vector<8x128xf32>
    %c0_6 = arith.constant 0 : index
    %c0_7 = arith.constant 0 : index
    %8 = vector.load %arg8[%c0_6, %c0_7] : memref<8x128xf32, #tpu.memory_space<vmem>>, vector<8x128xf32>
    tpu.vector_store %arg8[%c0_6, %c0_7], %7 {strides = array<i32>} : memref<8x128xf32, #tpu.memory_space<vmem>>, vector<8x128xf32>,
    %c1_i32 = arith.constant 1 : i32
    %9 = arith.cmpi eq, %arg1, %c1_i32 : i32
    %10 = arith.extui %9 : i1 to i32
    %c0_i32_8 = arith.constant 0 : i32
    %11 = arith.cmpi ne, %10, %c0_i32_8 : i32
    scf.if %11 {
      %c0_9 = arith.constant 0 : index
      %c0_10 = arith.constant 0 : index
      %12 = vector.load %arg8[%c0_9, %c0_10] : memref<8x128xf32, #tpu.memory_space<vmem>>, vector<8x128xf32>
      %13 = math.tanh %12 : vector<8x128xf32>
      %c0_11 = arith.constant 0 : index
      %c0_12 = arith.constant 0 : index
      %14 = vector.load %arg4[%c0_11, %c0_12] : memref<128x8xf32, #tpu.memory_space<vmem>>, vector<128x8xf32>
      %cst_13 = arith.constant dense<0.000000e+00> : vector<8x8xf32>
      %15 = tpu.matmul %13, %14, %cst_13 {dimension_numbers = #tpu.dot_dimension_numbers<[1], [0], [0], [1], [0, 0, 1, 1], [], []>} : vector<8x128xf32>, vector<128x8xf32>, vector<8x8xf32> -> vector<8x8xf32>
      %c0_14 = arith.constant 0 : index
      %c0_15 = arith.constant 0 : index
      %16 = vector.load %arg5[%c0_14, %c0_15] : memref<1x8xf32, #tpu.memory_space<vmem>>, vector<1x8xf32>
      %17 = vector.broadcast %16 : vector<1x8xf32> to vector<8x8xf32>
      %18 = arith.addf %15, %17 : vector<8x8xf32>
      %c0_16 = arith.constant 0 : index
      %c0_17 = arith.constant 0 : index
      %19 = vector.load %arg6[%c0_16, %c0_17] : memref<8x8xf32, #tpu.memory_space<vmem>>, vector<8x8xf32>
      %cst_18 = arith.constant 1.000000e-01 : f32
      %cst_19 = arith.constant 1.000000e+00 : f32
      %20 = vector.broadcast %cst_18 : f32 to vector<8x8xf32>
      %21 = arith.maximumf %20, %19 : vector<8x8xf32>
      %22 = vector.broadcast %cst_19 : f32 to vector<8x8xf32>
      %23 = arith.minimumf %22, %21 : vector<8x8xf32>
      %24 = vector.shape_cast %18 : vector<8x8xf32> to vector<8x8x1xf32>
      %25 = vector.shape_cast %18 : vector<8x8xf32> to vector<8x1x8xf32>
      %26 = vector.shape_cast %23 : vector<8x8xf32> to vector<1x8x8xf32>
      %27 = vector.broadcast %25 : vector<8x1x8xf32> to vector<8x8x8xf32>
      %28 = vector.broadcast %26 : vector<1x8x8xf32> to vector<8x8x8xf32>
      %29 = arith.mulf %27, %28 : vector<8x8x8xf32>
      %30 = vector.broadcast %24 : vector<8x8x1xf32> to vector<8x8x8xf32>
      %31 = arith.mulf %30, %29 : vector<8x8x8xf32>
      %cst_20 = arith.constant dense<0xFF800000> : vector<8x8xf32>
      %32 = vector.multi_reduction <maximumf>, %31, %cst_20 [2] : vector<8x8x8xf32> to vector<8x8xf32>
      %33 = tpu.iota {dimensions = array<i32: 1>} : vector<8x8xi32>
      %cst_21 = arith.constant dense<0xFF800000> : vector<8xf32>
      %34 = vector.multi_reduction <maximumf>, %32, %cst_21 [1] : vector<8x8xf32> to vector<8xf32>
      %35 = vector.shape_cast %34 : vector<8xf32> to vector<8x1xf32>
      %36 = vector.broadcast %35 : vector<8x1xf32> to vector<8x8xf32>
      %37 = arith.cmpf oge, %32, %36 : vector<8x8xf32>
      %c8_i32 = arith.constant 8 : i32
      %38 = vector.broadcast %c8_i32 : i32 to vector<8x8xi32>
      %39 = arith.select %37, %33, %38 : vector<8x8xi1>, vector<8x8xi32>
      %cst_22 = arith.constant dense<2147483647> : vector<8xi32>
      %40 = vector.multi_reduction <minsi>, %39, %cst_22 [1] : vector<8x8xi32> to vector<8xi32>
      %41 = vector.shape_cast %40 : vector<8xi32> to vector<8x1xi32>
      %42 = vector.broadcast %41 : vector<8x1xi32> to vector<8x8xi32>
      %43 = arith.cmpi eq, %33, %42 : vector<8x8xi32>
      %44 = arith.extui %43 : vector<8x8xi1> to vector<8x8xi32>
      %45 = arith.sitofp %44 : vector<8x8xi32> to vector<8x8xf32>
      %46 = vector.shape_cast %45 : vector<8x8xf32> to vector<8x8x1xf32>
      %47 = vector.shape_cast %23 : vector<8x8xf32> to vector<1x8x8xf32>
      %48 = vector.broadcast %46 : vector<8x8x1xf32> to vector<8x8x8xf32>
      %49 = vector.broadcast %47 : vector<1x8x8xf32> to vector<8x8x8xf32>
      %50 = arith.mulf %48, %49 : vector<8x8x8xf32>
      %cst_23 = arith.constant dense<0.000000e+00> : vector<8x8xf32>
      %51 = vector.multi_reduction <add>, %50, %cst_23 [1] : vector<8x8x8xf32> to vector<8x8xf32>
      %52 = arith.mulf %18, %51 : vector<8x8xf32>
      %cst_24 = arith.constant 0.000000e+00 : f32
      %cst_25 = arith.constant 1.000000e+00 : f32
      %53 = vector.broadcast %cst_24 : f32 to vector<8x8xf32>
      %54 = arith.maximumf %53, %52 : vector<8x8xf32>
      %55 = vector.broadcast %cst_25 : f32 to vector<8x8xf32>
      %56 = arith.minimumf %55, %54 : vector<8x8xf32>
      %c0_26 = arith.constant 0 : index
      %c0_27 = arith.constant 0 : index
      %57 = vector.load %arg7[%c0_26, %c0_27] : memref<8x8xf32, #tpu.memory_space<vmem>>, vector<8x8xf32>
      tpu.vector_store %arg7[%c0_26, %c0_27], %56 {strides = array<i32>} : memref<8x8xf32, #tpu.memory_space<vmem>>, vector<8x8xf32>,
    } else {
    }
    return
  }
  func.func @transform_0(%arg0: i32, %arg1: i32) -> (i32, i32) {
    %c0_i32 = arith.constant 0 : i32
    return %arg0, %arg1 : i32, i32
  }
  func.func @transform_1(%arg0: i32, %arg1: i32) -> (i32, i32) {
    %c0_i32 = arith.constant 0 : i32
    %c0_i32_0 = arith.constant 0 : i32
    return %arg1, %c0_i32 : i32, i32
  }
  func.func @transform_2(%arg0: i32, %arg1: i32) -> (i32, i32) {
    %c0_i32 = arith.constant 0 : i32
    %c0_i32_0 = arith.constant 0 : i32
    %c0_i32_1 = arith.constant 0 : i32
    return %c0_i32, %c0_i32_0 : i32, i32
  }
  func.func @transform_3(%arg0: i32, %arg1: i32) -> (i32, i32) {
    %c0_i32 = arith.constant 0 : i32
    %c0_i32_0 = arith.constant 0 : i32
    %c0_i32_1 = arith.constant 0 : i32
    return %c0_i32, %c0_i32_0 : i32, i32
  }
  func.func @transform_4(%arg0: i32, %arg1: i32) -> (i32, i32) {
    %c0_i32 = arith.constant 0 : i32
    %c0_i32_0 = arith.constant 0 : i32
    %c0_i32_1 = arith.constant 0 : i32
    return %c0_i32, %c0_i32_0 : i32, i32
  }
  func.func @transform_5(%arg0: i32, %arg1: i32) -> (i32, i32) {
    %c0_i32 = arith.constant 0 : i32
    %c0_i32_0 = arith.constant 0 : i32
    return %arg0, %c0_i32 : i32, i32
  }
}

</mosaic_0001>

<bundles_post_ra>
// kernel: tpu_custom_call.1
= control target key start
LH: loop header
LB: loop body
LE: loop exit
PB: predicated region body
PF: predicated region fallthrough
CT: control target
= control target key end

     0   :  { %10 = vsyncpa [#allocation4], 0  ;;  %s1870_s0 = inlined_call_operand.vmem [shape: bf16[8,1024], index: 0, kind: input, shape index: {}]   ;;  %s1871_s1 = inlined_call_operand.hbm [shape: bf16[1024,128], index: 1, kind: input, shape index: {}]   ;;  %s1872_s2 = inlined_call_operand.vmem [shape: f32[128,8], index: 2, kind: input, shape index: {}]   ;;  %s1873_s3 = inlined_call_operand.vmem [shape: f32[1,8], index: 3, kind: input, shape index: {}]   ;;  %s1874_s4 = inlined_call_operand.vmem [shape: f32[8,8], index: 4, kind: input, shape index: {}]   ;;  %s1875_s5 = inlined_call_operand.hbm [shape: f32[8,8], index: 5, kind: output, shape index: {}]  }
   0x1   :  { %12 = vsyncpa [#allocation4 + $0x1], 0 }
   0x2   :  { %13 = vsyncpa [#allocation5], 0  ;;  %s1577_s18 = smov 0   ;;  %s1579_s19 = smov 0  }
   0x3   :  { %s1581_s20 = smov 0   ;;  %s1583_s21 = smov 0  }
   0x4   :  { %s1585_s22 = smov 0   ;;  %s1587_s23 = smov 0  }
   0x5 LB: > { %s1151_s24 = sadd.s32 4294967295, %s1539_s23   ;;  %s28_s25 = sadd.s32 1, %s1535_s22  ;;  %s1539_s23 = sphi %s1587_s23, %s19_s23   ;;  %s1535_s22 = sphi %s1585_s22, %s1882_s22   ;;  %s1531_s21 = sphi %s1583_s21, %s1881_s21   ;;  %s1527_s20 = sphi %s1581_s20, %s1880_s20   ;;  %s1523_s19 = sphi %s1579_s19, %s1879_s19   ;;  %s1519_s18 = sphi %s1577_s18, %s1878_s18  }
   0x6   : > { %p29_p0 = scmp.ge.s32.totalorder %s28_s25, 2  ;;  %s66_s26 = sadd.s32 1, %s1527_s20 }
   0x7   : > { %p73_p1 = scmp.ne.s32.totalorder %s1527_s20, %s1523_s19  ;;  %p74_p2 = scmp.eq.s32.totalorder %s1539_s23, 0 }
   0x8   : > { %s1884_s25 = smov (%p29_p0, %s28_s25), 0  ;;  %p79_p4 = scmp.ne.s32.totalorder %s1523_s19, %s1519_s18 }
   0x9   : > { %p1613_p3 = por %p74_p2, %p73_p1  ;;  %s63_s28 = ssub.s32 %s1535_s22, %s1884_s25 }
   0xa   : > { %p80_p5 = scmp.eq.s32.totalorder %s1151_s24, 0  ;;  %p64_p6 = scmp.eq.s32.totalorder %s63_s28, 0 }
   0xb   : > { %p1339_p8 = scmp.lt.s32.totalorder %s1539_s23, 2  ;;  %s214_s6 = sand.u32 1, %s1527_s20  }
   0xc   : > { %p1622_p7 = por %p80_p5, %p79_p4  ;;  %s1296_s7 = sshll.u32 %s1535_s22, 8 }
   0xd   : > { %s1628_s30 = scalar_select %p64_p6, %s1527_s20, %s66_s26  }
   0xe   : > { %s1154_s8 = sshll.u32 %s214_s6, 8  ;;  %s223_s11 = scalar_lea.hbm %s1871_s1, %s1296_s7 }
   0xf   : > { %s224_s12 = sshll.u32 %s223_s11, 4  ;;  %s218_s13 = scalar_lea.vmem [#allocation3], %s1154_s8  ;;  %s225_s12 = int_to_ptr.hbm [resolvable:$true] %s224_s12 }
  0x10   : > { %s226_s14 = sshll.u32 %s218_s13, 4  ;;  %p1336_p9 = pnand %p1339_p8, %p1613_p3  ;;  %s227_s14 = int_to_ptr.vmem [resolvable:$true] %s226_s14 }
  0x11   : > { %p1157_p10 = scmp.ge.s32.totalorder %s1539_s23, 1  ;;  %p234_p11 = scmp.lt.s32.totalorder %s1539_s23, 3 }
  0x12   : > { %s215_s15 = scalar_lea.sflag [#allocation4], %s214_s6  ;;  %s1541_s16 = smov 64  }
  0x13   : > { %s1542_s17 = smov 4   ;;  %p235_p12 = pnand %p1157_p10, %p234_p11 }
  0x14   : > { %1338 = dma.hbm_to_vmem [thread:$0]  (!%p1336_p9), %s225_s12, 4096, %s227_s14, %s215_s15, %s1541_s16, %s1541_s16, %s1542_s17  }
  0x15   : > { %238 = sbr.rel (%p235_p12) target bundleno = 1288 (0x508), region = 40  ;;  %s240_s18 = sand.u32 (!%p235_p12), 1, %s1523_s19  }
  0x16   : > { %s1158_s26 = sshll.u32 (!%p235_p12), %s240_s18, 8  ;;  %s241_s28 = scalar_lea.sflag (!%p235_p12), [#allocation4], %s240_s18 }
  0x17   : > { %s1640_s7 = scalar_lea.vmem (!%p235_p12), [#allocation3], %s1158_s26 }
  0x1a   : > { %1510 = dma.done.wait (%p1622_p7), %s241_s28, 4096  }
  0x1b   : > { %1512 = vsyncadd (%p1622_p7), %s241_s28, 4294963200  ;;  %s1159_s27 = sshll.u32 %s1531_s21, 2  ;;  %p1161_p0 = scmp.ne.s32.totalorder %s1531_s21, 0 }
  0x1c   : > { %p279_p13 = scmp.lt.s32.totalorder %s1159_s27, 7 }
  0x1d   : > { %290 = sbr.rel (%p1161_p0) target bundleno = 36 (0x24), region = 48 }
  0x1e   : > { %s1886_s27 = smov (!%p279_p13, %s1159_s27), 7 }
  0x1f   : > { %s1160_s6 = sshll.u32 %s1886_s27, 2 }
  0x20   : > { %s1650_s10 = scalar_lea.vmem %s1870_s0, %s1160_s6 }
  0x22   : > { %v1543_v0 = vmov 0.0  }
  0x23   : > { %291 = vst [vmem:[#allocation2] sm:$0xff] %v1543_v0 }
  0x24 PF: > { %v1304_v1 = vld [vmem:[%s1640_s7 + $0x38] sm:$0xff]  ;;  %v1303_v5 = vld [vmem:[%s1640_s7 + $0x30] sm:$0xff]  ;;  %v1302_v9 = vld [vmem:[%s1640_s7 + $0x28] sm:$0xff]  ;;  %p1290_p1 = scmp.ne.s32.totalorder %s1531_s21, 1 }
  0x25   : > { %v1312_v2 = vld [vmem:[%s1640_s7 + $0x78] sm:$0xff]  ;;  %565 = vmatpush.bf16.msra.mxu0 %v1304_v1  ;;  %v1311_v6 = vld [vmem:[%s1640_s7 + $0x70] sm:$0xff]  ;;  %v1310_v10 = vld [vmem:[%s1640_s7 + $0x68] sm:$0xff] }
  0x26   : > { %v1320_v3 = vld [vmem:[%s1640_s7 + $0xb8] sm:$0xff]  ;;  %578 = vmatpush.bf16.msra.mxu1 %v1312_v2  ;;  %v1319_v7 = vld [vmem:[%s1640_s7 + $0xb0] sm:$0xff]  ;;  %v1318_v11 = vld [vmem:[%s1640_s7 + $0xa8] sm:$0xff] }
  0x27   : > { %v1328_v4 = vld [vmem:[%s1640_s7 + $0xf8] sm:$0xff]  ;;  %591 = vmatpush.bf16.msra.mxu2 %v1320_v3  ;;  %v1327_v8 = vld [vmem:[%s1640_s7 + $0xf0] sm:$0xff]  ;;  %v1326_v12 = vld [vmem:[%s1640_s7 + $0xe8] sm:$0xff] }
  0x28   : > { %604 = vmatpush.bf16.msra.mxu3 %v1328_v4  ;;  %v1301_v13 = vld [vmem:[%s1640_s7 + $0x20] sm:$0xff]  ;;  %v1300_v17 = vld [vmem:[%s1640_s7 + $0x18] sm:$0xff]  ;;  %v1299_v21 = vld [vmem:[%s1640_s7 + $0x10] sm:$0xff] }
  0x29   : > { %566 = vmatpush.bf16.msra.mxu0 %v1303_v5  ;;  %v1309_v14 = vld [vmem:[%s1640_s7 + $0x60] sm:$0xff]  ;;  %v1308_v18 = vld [vmem:[%s1640_s7 + $0x58] sm:$0xff]  ;;  %v1307_v22 = vld [vmem:[%s1640_s7 + $0x50] sm:$0xff] }
  0x2a   : > { %579 = vmatpush.bf16.msra.mxu1 %v1311_v6  ;;  %v1317_v15 = vld [vmem:[%s1640_s7 + $0xa0] sm:$0xff]  ;;  %v1316_v19 = vld [vmem:[%s1640_s7 + $0x98] sm:$0xff]  ;;  %v1315_v23 = vld [vmem:[%s1640_s7 + $0x90] sm:$0xff] }
  0x2b   : > { %592 = vmatpush.bf16.msra.mxu2 %v1319_v7  ;;  %v1325_v16 = vld [vmem:[%s1640_s7 + $0xe0] sm:$0xff]  ;;  %v1324_v20 = vld [vmem:[%s1640_s7 + $0xd8] sm:$0xff]  ;;  %v1323_v24 = vld [vmem:[%s1640_s7 + $0xd0] sm:$0xff] }
  0x2c   : > { %605 = vmatpush.bf16.msra.mxu3 %v1327_v8  ;;  %v1298_v25 = vld [vmem:[%s1640_s7 + $0x8] sm:$0xff]  ;;  %v293_v27 = vld [vmem:[%s1650_s10] sm:$0xff]  ;;  %v294_v30 = vld [vmem:[%s1650_s10 + $0x8] sm:$0xff] }
  0x2d   : > { %567 = vmatpush.bf16.msra.mxu0 %v1302_v9  ;;  %v1306_v26 = vld [vmem:[%s1640_s7 + $0x48] sm:$0xff]  ;;  %v361_v31 = vunpack.c.l.b16 %v293_v27  ;;  %v362_v32 = vunpack.c.h.b16 %v293_v27  ;;  %v1297_v33 = vld [vmem:[%s1640_s7] sm:$0xff]  ;;  %v363_v35 = vunpack.c.l.b16 %v294_v30  ;;  %v364_v36 = vunpack.c.h.b16 %v294_v30  ;;  %v292_v51 = vld [vmem:[#allocation2] sm:$0xff] }
  0x2e   : > { %580 = vmatpush.bf16.msra.mxu1 %v1310_v10  ;;  %v1314_v28 = vld [vmem:[%s1640_s7 + $0x88] sm:$0xff]  ;;  %v1305_v34 = vld [vmem:[%s1640_s7 + $0x40] sm:$0xff] }
  0x2f   : > { %593 = vmatpush.bf16.msra.mxu2 %v1318_v11  ;;  %v1322_v29 = vld [vmem:[%s1640_s7 + $0xc8] sm:$0xff]  ;;  %v1313_v37 = vld [vmem:[%s1640_s7 + $0x80] sm:$0xff]  ;;  %v365_v39 = vpack.c.b16 %v361_v31, %v361_v31  ;;  %v366_v40 = vpack.c.b16 %v362_v32, %v362_v32  ;;  %v367_v41 = vpack.c.b16 %v363_v35, %v363_v35  ;;  %v368_v42 = vpack.c.b16 %v364_v36, %v364_v36 }
  0x30   : > { %606 = vmatpush.bf16.msra.mxu3 %v1326_v12  ;;  %v1321_v38 = vld [vmem:[%s1640_s7 + $0xc0] sm:$0xff] }
  0x31   : > { %568 = vmatpush.bf16.msra.mxu0 %v1301_v13 }
  0x32   : > { %581 = vmatpush.bf16.msra.mxu1 %v1309_v14 }
  0x33   : > { %594 = vmatpush.bf16.msra.mxu2 %v1317_v15 }
  0x34   : > { %607 = vmatpush.bf16.msra.mxu3 %v1325_v16 }
  0x35   : > { %569 = vmatpush.bf16.msra.mxu0 %v1300_v17 }
  0x36   : > { %582 = vmatpush.bf16.msra.mxu1 %v1308_v18 }
  0x37   : > { %595 = vmatpush.bf16.msra.mxu2 %v1316_v19 }
  0x38   : > { %608 = vmatpush.bf16.msra.mxu3 %v1324_v20 }
  0x39   : > { %570 = vmatpush.bf16.msra.mxu0 %v1299_v21 }
  0x3a   : > { %583 = vmatpush.bf16.msra.mxu1 %v1307_v22 }
  0x3b   : > { %596 = vmatpush.bf16.msra.mxu2 %v1315_v23 }
  0x3c   : > { %609 = vmatpush.bf16.msra.mxu3 %v1323_v24 }
  0x3d   : > { %571 = vmatpush.bf16.msra.mxu0 %v1298_v25 }
  0x3e   : > { %584 = vmatpush.bf16.msra.mxu1 %v1306_v26 }
  0x3f   : > { %597 = vmatpush.bf16.msra.mxu2 %v1314_v28 }
  0x40   : > { %610 = vmatpush.bf16.msra.mxu3 %v1322_v29 }
  0x41   : > { %572 = vmatpush.bf16.msra.mxu0 %v1297_v33 }
  0x42   : > { %585 = vmatpush.bf16.msra.mxu1 %v1305_v34 }
  0x43   : > { %598 = vmatpush.bf16.msra.mxu2 %v1313_v37 }
  0x44   : > { %611 = vmatpush.bf16.msra.mxu3 %v1321_v38  ;;  %573 = vmatmul.bf16.vlgmr.msra.gmra.mxu0 %v365_v39 }
  0x45   : > { %586 = vmatmul.bf16.vlgmr.msra.gmra.mxu1 %v366_v40 }
  0x46   : > { %599 = vmatmul.bf16.vlgmr.msra.gmra.mxu2 %v367_v41 }
  0x47   : > { %612 = vmatmul.bf16.vlgmr.msra.gmra.mxu3 %v368_v42 }
  0xc1   : > { %v574_v43 = vpop.f32.mrf.mxu0 }
  0xc2   : > { %v587_v44 = vpop.f32.mrf.mxu1 }
  0xc3   : > { %v588_v45 = vadd.f32 %v587_v44, %v574_v43 }
  0xc9   : > { %v600_v46 = vpop.f32.mrf.mxu2  ;;  %v576_v49 = vpop.f32.mrf.mxu0 }
  0xca   : > { %v613_v47 = vpop.f32.mrf.mxu3  ;;  %v601_v48 = vadd.f32 %v600_v46, %v588_v45  ;;  %v589_v50 = vpop.f32.mrf.mxu1 }
  0xcc   : > { %v614_v52 = vadd.f32 %v613_v47, %v601_v48 }
  0xce   : > { %v617_v53 = vadd.f32 %v614_v52, %v292_v51  ;;  %622 = sbr.rel (%p1290_p1) target bundleno = 1282 (0x502), region = 52 }
  0xd0   : > { %618 = vst [vmem:[#allocation2] sm:$0xff] %v617_v53 }
  0xd1   : > { %v602_v54 = vpop.f32.mrf.mxu2 }
  0xd2   : > { %v615_v55 = vpop.f32.mrf.mxu3 }
  0xd3   : > { %v640_v56 = vld [vmem:[%s1872_s2 + $0x78] sm:$0xff]  ;;  %v639_v57 = vld [vmem:[%s1872_s2 + $0x70] sm:$0xff]  ;;  %v669_v58 = vlaneseq  ;;  %v638_v59 = vld [vmem:[%s1872_s2 + $0x68] sm:$0xff]  ;;  %vm764_vm0 = vcmask 64512   ;;  %vm807_vm1 = vcmask 1041409   ;;  %vm809_vm2 = vcmask 1042434  }
  0xd4   : > { %645 = vmatpush.msra.mxu0 %v640_v56  ;;  %v637_v61 = vld [vmem:[%s1872_s2 + $0x60] sm:$0xff]  ;;  %v636_v62 = vld [vmem:[%s1872_s2 + $0x58] sm:$0xff]  ;;  %v635_v63 = vld [vmem:[%s1872_s2 + $0x50] sm:$0xff]  ;;  %vm811_vm3 = vcmask 1043459   ;;  %vm813_vm4 = vcmask 1044484   ;;  %vm815_vm5 = vcmask 1045509  }
  0xd5   : > { %v1698_v60 = vshrl.u32 %v669_v58, 7  ;;  %v634_v0 = vld [vmem:[%s1872_s2 + $0x48] sm:$0xff]  ;;  %v633_v1 = vld [vmem:[%s1872_s2 + $0x40] sm:$0xff]  ;;  %v632_v2 = vld [vmem:[%s1872_s2 + $0x38] sm:$0xff]  ;;  %vm817_vm6 = vcmask 1046534   ;;  %vm819_vm7 = vcmask 1047559  }
  0xd6   : > { %646 = vmatpush.msra.mxu0 %v639_v57  ;;  %v631_v3 = vld [vmem:[%s1872_s2 + $0x30] sm:$0xff]  ;;  %v630_v4 = vld [vmem:[%s1872_s2 + $0x28] sm:$0xff]  ;;  %v629_v5 = vld [vmem:[%s1872_s2 + $0x20] sm:$0xff] }
  0xd7   : > { %1398 = vset.pattern.permute.xlu2 %v1698_v60  ;;  %1397 = vset.pattern.permute.xlu1 %v1698_v60  ;;  %v623_v6 = vld [vmem:[#allocation2] sm:$0xff]  ;;  %v628_v7 = vld [vmem:[%s1872_s2 + $0x18] sm:$0xff]  ;;  %v627_v8 = vld [vmem:[%s1872_s2 + $0x10] sm:$0xff] }
  0xd8   : > { %647 = vmatpush.msra.mxu0 %v638_v59  ;;  %1396 = vset.pattern.permute.xlu0 %v1698_v60  ;;  %1425 = vtanh.f32 %v623_v6  ;;  %v626_v9 = vld [vmem:[%s1872_s2 + $0x8] sm:$0xff]  ;;  %v625_v10 = vld [vmem:[%s1872_s2] sm:$0xff] }
  0xd9   : > { %v1424_v12 = vld [vmem:[%s1873_s3] ss:$0 sm:$0xff] }
  0xda   : > { %648 = vmatpush.msra.mxu0 %v637_v61  ;;  %v665_v23 = vld [vmem:[%s1874_s4] sm:$0xff] }
  0xdb   : > { %v666_v25 = vmax.f32 %v665_v23, 0.1 }
  0xdc   : > { %649 = vmatpush.msra.mxu0 %v636_v62 }
  0xdd   : > { %v1759_v27 = vmin.f32 %v666_v25, 1.0 }
  0xde   : > { %650 = vmatpush.msra.mxu0 %v635_v63  ;;  %v1426_v11 = vpop.eup %1425 }
  0xe0   : > { %651 = vmatpush.msra.mxu0 %v634_v0 }
  0xe2   : > { %652 = vmatpush.msra.mxu0 %v633_v1 }
  0xe4   : > { %653 = vmatpush.msra.mxu0 %v632_v2 }
  0xe6   : > { %654 = vmatpush.msra.mxu0 %v631_v3 }
  0xe8   : > { %655 = vmatpush.msra.mxu0 %v630_v4 }
  0xea   : > { %656 = vmatpush.msra.mxu0 %v629_v5 }
  0xec   : > { %657 = vmatpush.msra.mxu0 %v628_v7 }
  0xee   : > { %658 = vmatpush.msra.mxu0 %v627_v8 }
  0xf0   : > { %659 = vmatpush.msra.mxu0 %v626_v9 }
  0xf2   : > { %660 = vmatpush.msra.mxu0 %v625_v10  ;;  %v1784_v10 = vand.u32 127, %v669_v58 }
  0xf3   : > { %661 = vmatmul.f32.vlgmr.msra.gmra.mxu0 %v1426_v11 }
 0x170   : > { %v662_v13 = vpop.f32.mrf.mxu0 }
 0x171   : > { %v1745_v14 = vadd.f32 %v1424_v12, %v662_v13 }
 0x173   : > { %v696_v15 = vperm.slane %v1745_v14, 4  ;;  %v682_v16 = vperm.slane %v1745_v14, 2  ;;  %v668_v17 = vperm.slane %v1745_v14, 0  ;;  %v703_v18 = vperm.slane %v1745_v14, 5 }
 0x174   : > { %v689_v19 = vperm.slane %v1745_v14, 3  ;;  %v675_v20 = vperm.slane %v1745_v14, 1  ;;  %v717_v21 = vperm.slane %v1745_v14, 7  ;;  %v710_v22 = vperm.slane %v1745_v14, 6 }
 0x175   : > { %701 = vperm.xlu2 %1398, %v696_v15   ;;  %687 = vperm.xlu1 %1397, %v682_v16   ;;  %v726_v24 = vrot.slane %v1745_v14, 2  ;;  %v727_v29 = vrot.slane %v1745_v14, 3  ;;  %v748_v31 = vmul.f32 %v668_v17, %v1759_v27  ;;  %v725_v32 = vrot.slane %v1745_v14, 1 }
 0x176   : > { %673 = vperm.xlu0 %1396, %v668_v17   ;;  %v729_v41 = vrot.slane %v1745_v14, 5  ;;  %v728_v42 = vrot.slane %v1745_v14, 4  ;;  %v730_v46 = vrot.slane %v1745_v14, 6  ;;  %v731_v59 = vrot.slane %v1745_v14, 7 }
 0x177   : > { %v734_v26 = vperm.slane %v726_v24, 0  ;;  %v735_v38 = vperm.slane %v727_v29, 0  ;;  %v733_v40 = vperm.slane %v725_v32, 0 }
 0x178   : > { %v737_v49 = vperm.slane %v729_v41, 0  ;;  %v736_v51 = vperm.slane %v728_v42, 0  ;;  %v738_v54 = vperm.slane %v730_v46, 0  ;;  %v739_v2 = vperm.slane %v731_v59, 0 }
 0x179   : > { %v750_v28 = vmul.f32 %v734_v26, %v1759_v27  ;;  %v751_v43 = vmul.f32 %v735_v38, %v1759_v27  ;;  %v749_v45 = vmul.f32 %v733_v40, %v1759_v27 }
 0x17a   : > { %v753_v56 = vmul.f32 %v737_v49, %v1759_v27  ;;  %v752_v57 = vmul.f32 %v736_v51, %v1759_v27  ;;  %v754_v62 = vmul.f32 %v738_v54, %v1759_v27  ;;  %v755_v7 = vmul.f32 %v739_v2, %v1759_v27 }
 0x17d   : > { %708 = vperm.xlu2 %1398, %v703_v18   ;;  %694 = vperm.xlu1 %1397, %v689_v19  }
 0x17e   : > { %680 = vperm.xlu0 %1396, %v675_v20  }
 0x185   : > { %722 = vperm.xlu1 %1397, %v717_v21  }
 0x186   : > { %715 = vperm.xlu0 %1396, %v710_v22  }
 0x1cf   : > { %v702_v36 = vpop.permute.xlu2 %701 }
 0x1d0   : > { %v760_v63 = vmul.f32 %v752_v57, %v702_v36  ;;  %v1544_v36 = vmov 0  }
 0x1d1   : > { %1399 = vset.pattern.permute.xlu2 %v1544_v36  ;;  %1400 = vset.pattern.permute.xlu0 %v1544_v36 }
 0x1d2   : > { %v777_v5 = vsel %vm764_vm0, %v760_v63, -inf }
 0x1d7   : > { %v709_v55 = vpop.permute.xlu2 %708 }
 0x1d8   : > { %v761_v61 = vmul.f32 %v753_v56, %v709_v55 }
 0x1da   : > { %v780_v3 = vsel %vm764_vm0, %v761_v61, -inf }
 0x1e7   : > { %v688_v30 = vpop.permute.xlu1 %687 }
 0x1e8   : > { %v758_v33 = vmul.f32 %v750_v28, %v688_v30  ;;  %v674_v34 = vpop.permute.xlu0 %673 }
 0x1e9   : > { %v756_v35 = vmul.f32 %v748_v31, %v674_v34 }
 0x1ea   : > { %v771_v37 = vsel %vm764_vm0, %v758_v33, -inf }
 0x1eb   : > { %772 = vmax.xlane.f32.xlu1 %v771_v37  ;;  %v765_v39 = vsel %vm764_vm0, %v756_v35, -inf }
 0x1ec   : > { %766 = vmax.xlane.f32.xlu2 %v765_v39 }
 0x1ef   : > { %v695_v44 = vpop.permute.xlu1 %694 }
 0x1f0   : > { %v759_v47 = vmul.f32 %v751_v43, %v695_v44  ;;  %v681_v48 = vpop.permute.xlu0 %680 }
 0x1f1   : > { %v757_v50 = vmul.f32 %v749_v45, %v681_v48 }
 0x1f2   : > { %v774_v52 = vsel %vm764_vm0, %v759_v47, -inf }
 0x1f3   : > { %v768_v53 = vsel %vm764_vm0, %v757_v50, -inf }
 0x1f4   : > { %769 = vmax.xlane.f32.xlu0 %v768_v53  ;;  %775 = vmax.xlane.f32.xlu2 %v774_v52 }
 0x1f7   : > { %v723_v6 = vpop.permute.xlu1 %722 }
 0x1f8   : > { %v716_v0 = vpop.permute.xlu0 %715  ;;  %v763_v8 = vmul.f32 %v755_v7, %v723_v6 }
 0x1f9   : > { %v762_v1 = vmul.f32 %v754_v62, %v716_v0 }
 0x1fa   : > { %v786_v9 = vsel %vm764_vm0, %v763_v8, -inf }
 0x1fb   : > { %v783_v4 = vsel %vm764_vm0, %v762_v1, -inf }
 0x1fc   : > { %781 = vmax.xlane.f32.xlu0 %v780_v3  ;;  %784 = vmax.xlane.f32.xlu1 %v783_v4 }
 0x1fd   : > { %778 = vmax.xlane.f32.xlu2 %v777_v5 }
 0x205   : > { %787 = vmax.xlane.f32.xlu2 %v786_v9 }
 0x215   : > { %854 = vperm.xlu1 %1397, %v1784_v10  }
 0x21d   : > { %1401 = vset.pattern.permute.xlu1 %v1544_v36 }
 0x25e   : > { %v773_v16 = vpop.xlane.xlu1 %772 }
 0x25f   : > { %v767_v11 = vpop.xlane.xlu2 %766  ;;  %v801_v19 = vperm.slane %v773_v16, %v1784_v10 }
 0x260   : > { %v799_v17 = vperm.slane %v767_v11, %v1784_v10 }
 0x267   : > { %v770_v12 = vpop.xlane.xlu0 %769  ;;  %v776_v13 = vpop.xlane.xlu2 %775 }
 0x268   : > { %v800_v15 = vperm.slane %v770_v12, %v1784_v10  ;;  %v802_v22 = vperm.slane %v776_v13, %v1784_v10 }
 0x26a   : > { %v808_v18 = vsel %vm807_vm1, %v800_v15, %v799_v17 }
 0x26b   : > { %v810_v20 = vsel %vm809_vm2, %v801_v19, %v808_v18 }
 0x26c   : > { %v812_v24 = vsel %vm811_vm3, %v802_v22, %v810_v20 }
 0x26f   : > { %v782_v58 = vpop.xlane.xlu0 %781  ;;  %v785_v28 = vpop.xlane.xlu1 %784 }
 0x270   : > { %v779_v21 = vpop.xlane.xlu2 %778  ;;  %v804_v25 = vperm.slane %v782_v58, %v1784_v10  ;;  %v805_v30 = vperm.slane %v785_v28, %v1784_v10 }
 0x271   : > { %v803_v23 = vperm.slane %v779_v21, %v1784_v10 }
 0x273   : > { %v814_v26 = vsel %vm813_vm4, %v803_v23, %v812_v24 }
 0x274   : > { %v816_v29 = vsel %vm815_vm5, %v804_v25, %v814_v26 }
 0x275   : > { %v818_v33 = vsel %vm817_vm6, %v805_v30, %v816_v29  ;;  %v1545_v29 = vmov 0.0  }
 0x278   : > { %v788_v31 = vpop.xlane.xlu2 %787 }
 0x279   : > { %v806_v32 = vperm.slane %v788_v31, %v1784_v10 }
 0x27b   : > { %v820_v34 = vsel %vm819_vm7, %v806_v32, %v818_v33 }
 0x27c   : > { %v822_v35 = vsel %vm764_vm0, %v820_v34, -inf }
 0x27d   : > { %823 = vmax.xlane.f32.xlu0 %v822_v35 }
 0x287   : > { %v855_v41 = vpop.permute.xlu1 %854 }
 0x2f0   : > { %v824_v37 = vpop.xlane.xlu0 %823 }
 0x2f1   : > { %v828_v38 = vperm.slane %v824_v37, 2  ;;  %v827_v39 = vperm.slane %v824_v37, 1  ;;  %v826_v40 = vperm.slane %v824_v37, 0  ;;  %v830_v45 = vperm.slane %v824_v37, 4 }
 0x2f2   : > { %v829_v46 = vperm.slane %v824_v37, 3  ;;  %v832_v49 = vperm.slane %v824_v37, 6  ;;  %v831_v50 = vperm.slane %v824_v37, 5  ;;  %v833_v53 = vperm.slane %v824_v37, 7 }
 0x2f3   : > { %vm844_vm8 = vcmp.ge.f32.partialorder %v773_v16, %v828_v38  ;;  %vm843_vm9 = vcmp.ge.f32.partialorder %v770_v12, %v827_v39  ;;  %vm842_vm10 = vcmp.ge.f32.partialorder %v767_v11, %v826_v40  ;;  %vm846_vm11 = vcmp.ge.f32.partialorder %v779_v21, %v830_v45 }
 0x2f4   : > { %v858_v42 = vsel %vm844_vm8, %v855_v41, 8  ;;  %v857_v43 = vsel %vm843_vm9, %v855_v41, 8  ;;  %v856_v44 = vsel %vm842_vm10, %v855_v41, 8  ;;  %vm845_vm12 = vcmp.ge.f32.partialorder %v776_v13, %v829_v46 }
 0x2f5   : > { %871 = vperm.xlu1 %1401, %v858_v42   ;;  %868 = vperm.xlu0 %1400, %v857_v43   ;;  %v860_v47 = vsel %vm846_vm11, %v855_v41, 8  ;;  %v859_v48 = vsel %vm845_vm12, %v855_v41, 8  ;;  %vm848_vm13 = vcmp.ge.f32.partialorder %v785_v28, %v832_v49  ;;  %vm847_vm14 = vcmp.ge.f32.partialorder %v782_v58, %v831_v50 }
 0x2f6   : > { %865 = vperm.xlu2 %1399, %v856_v44   ;;  %v862_v51 = vsel %vm848_vm13, %v855_v41, 8  ;;  %v861_v52 = vsel %vm847_vm14, %v855_v41, 8  ;;  %vm849_vm15 = vcmp.ge.f32.partialorder %v788_v31, %v833_v53 }
 0x2f7   : > { %v863_v54 = vsel %vm849_vm15, %v855_v41, 8 }
 0x2fd   : > { %877 = vperm.xlu1 %1401, %v860_v47   ;;  %1423 = vset.pattern.permute.xlu0 %v1698_v60 }
 0x2fe   : > { %874 = vperm.xlu2 %1399, %v859_v48  }
 0x305   : > { %883 = vperm.xlu1 %1401, %v862_v51  }
 0x306   : > { %880 = vperm.xlu2 %1399, %v861_v52  }
 0x30e   : > { %886 = vperm.xlu2 %1399, %v863_v54  }
 0x316   : > { %1402 = vset.pattern.permute.xlu2 %v1698_v60 }
 0x350   : > { %v866_v55 = vpop.permute.xlu2 %865 }
 0x351   : > { %v888_v63 = vperm.slane %v866_v55, %v1784_v10 }
 0x358   : > { %v875_v56 = vpop.permute.xlu2 %874 }
 0x359   : > { %v891_v60 = vperm.slane %v875_v56, %v1784_v10 }
 0x360   : > { %v881_v62 = vpop.permute.xlu2 %880 }
 0x361   : > { %v893_v8 = vperm.slane %v881_v62, %v1784_v10 }
 0x367   : > { %v872_v57 = vpop.permute.xlu1 %871  ;;  %v869_v59 = vpop.permute.xlu0 %868 }
 0x368   : > { %v889_v61 = vperm.slane %v869_v59, %v1784_v10  ;;  %v890_v0 = vperm.slane %v872_v57, %v1784_v10  ;;  %v887_v6 = vpop.permute.xlu2 %886 }
 0x369   : > { %v895_v12 = vperm.slane %v887_v6, %v1784_v10 }
 0x36a   : > { %v896_v1 = vsel %vm807_vm1, %v889_v61, %v888_v63 }
 0x36b   : > { %v897_v3 = vsel %vm809_vm2, %v890_v0, %v896_v1 }
 0x36c   : > { %v898_v5 = vsel %vm811_vm3, %v891_v60, %v897_v3 }
 0x36f   : > { %v878_v2 = vpop.permute.xlu1 %877 }
 0x370   : > { %v892_v4 = vperm.slane %v878_v2, %v1784_v10 }
 0x372   : > { %v899_v7 = vsel %vm813_vm4, %v892_v4, %v898_v5 }
 0x373   : > { %v900_v13 = vsel %vm815_vm5, %v893_v8, %v899_v7 }
 0x377   : > { %v884_v9 = vpop.permute.xlu1 %883 }
 0x378   : > { %v894_v11 = vperm.slane %v884_v9, %v1784_v10 }
 0x37a   : > { %v901_v15 = vsel %vm817_vm6, %v894_v11, %v900_v13 }
 0x37b   : > { %v902_v16 = vsel %vm819_vm7, %v895_v12, %v901_v15 }
 0x37c   : > { %v903_v17 = vsel %vm764_vm0, %v902_v16, 2147483647 }
 0x37d   : > { %v905_v18 = vshra.s32 %v903_v17, 16  ;;  %v904_v20 = vand.u32 65535, %v903_v17 }
 0x37f   : > { %v907_v19 = vcvt.s32.f32 %v905_v18  ;;  %v906_v21 = vcvt.s32.f32 %v904_v20 }
 0x381   : > { %908 = vmin.xlane.f32.xlu0 %v907_v19 }
 0x3f4   : > { %v909_v58 = vpop.xlane.xlu0 %908 }
 0x3f5   : > { %vm910_vm8 = vcmp.eq.f32.partialorder %v907_v19, %v909_v58  ;;  %v915_v23 = vcvt.f32.s32 %v909_v58 }
 0x3f6   : > { %v911_v22 = vsel %vm910_vm8, %v906_v21, inf }
 0x3f7   : > { %912 = vmin.xlane.f32.xlu1 %v911_v22  ;;  %v916_v25 = vshll.u32 %v915_v23, 16 }
 0x46a   : > { %v913_v24 = vpop.xlane.xlu1 %912 }
 0x46b   : > { %v914_v26 = vcvt.f32.s32 %v913_v24 }
 0x46d   : > { %v917_v28 = vadd.s32 %v916_v25, %v914_v26 }
 0x46f   : > { %vm918_vm9 = vcmp.eq.s32.totalorder %v1784_v10, %v917_v28 }
 0x470   : > { %v1291_v30 = vsel %vm918_vm9, 1.0, %v1545_v29 }
 0x471   : > { %v921_v31 = vperm.slane %v1291_v30, 0  ;;  %v928_v32 = vperm.slane %v1291_v30, 1  ;;  %v935_v34 = vperm.slane %v1291_v30, 2  ;;  %v942_v35 = vperm.slane %v1291_v30, 3 }
 0x472   : > { %v949_v37 = vperm.slane %v1291_v30, 4  ;;  %v956_v38 = vperm.slane %v1291_v30, 5  ;;  %v963_v40 = vperm.slane %v1291_v30, 6  ;;  %v970_v41 = vperm.slane %v1291_v30, 7 }
 0x473   : > { %v1403_v33 = vpack.i.bf16 %v928_v32, %v921_v31  ;;  %v1408_v36 = vpack.i.bf16 %v942_v35, %v935_v34 }
 0x474   : > { %v1413_v39 = vpack.i.bf16 %v956_v38, %v949_v37  ;;  %v1418_v42 = vpack.i.bf16 %v970_v41, %v963_v40 }
 0x475   : > { %1404 = vperm.xlu2 %1402, %v1403_v33  }
 0x47d   : > { %1409 = vperm.xlu2 %1402, %v1408_v36  }
 0x485   : > { %1414 = vperm.xlu2 %1402, %v1413_v39  }
 0x48d   : > { %1419 = vperm.xlu2 %1402, %v1418_v42  }
 0x4cf   : > { %v1405_v43 = vpop.permute.xlu2 %1404 }
 0x4d0   : > { %v1407_v10 = vunpack.i.h.bf16 %v1405_v43  ;;  %v1406_v44 = vunpack.i.l.bf16 %v1405_v43 }
 0x4d2   : > { %v978_v45 = vmul.f32 %v1407_v10, %v1759_v27  ;;  %v977_v46 = vmul.f32 %v1406_v44, %v1759_v27 }
 0x4d4   : > { %v992_v47 = vsel %vm764_vm0, %v978_v45, 0.0  ;;  %v985_v48 = vsel %vm764_vm0, %v977_v46, 0.0 }
 0x4d5   : > { %v993_v49 = vrot.slane %v992_v47, 4  ;;  %v986_v50 = vrot.slane %v985_v48, 4 }
 0x4d7   : > { %v1410_v51 = vpop.permute.xlu2 %1409  ;;  %v994_v56 = vadd.f32 %v993_v49, %v992_v47  ;;  %v987_v57 = vadd.f32 %v986_v50, %v985_v48 }
 0x4d8   : > { %v1412_v52 = vunpack.i.h.bf16 %v1410_v51  ;;  %v1411_v53 = vunpack.i.l.bf16 %v1410_v51 }
 0x4d9   : > { %v995_v0 = vrot.slane %v994_v56, 2  ;;  %v988_v1 = vrot.slane %v987_v57, 2 }
 0x4da   : > { %v980_v54 = vmul.f32 %v1412_v52, %v1759_v27  ;;  %v979_v55 = vmul.f32 %v1411_v53, %v1759_v27 }
 0x4db   : > { %v996_v9 = vadd.f32 %v995_v0, %v994_v56  ;;  %v989_v11 = vadd.f32 %v988_v1, %v987_v57 }
 0x4dc   : > { %v1006_v59 = vsel %vm764_vm0, %v980_v54, 0.0  ;;  %v999_v61 = vsel %vm764_vm0, %v979_v55, 0.0 }
 0x4dd   : > { %v1007_v62 = vrot.slane %v1006_v59, 4  ;;  %v1000_v63 = vrot.slane %v999_v61, 4  ;;  %v997_v19 = vrot.slane %v996_v9, 1  ;;  %v990_v20 = vrot.slane %v989_v11, 1 }
 0x4df   : > { %v1001_v2 = vadd.f32 %v1000_v63, %v999_v61  ;;  %v1415_v3 = vpop.permute.xlu2 %1414  ;;  %v1008_v4 = vadd.f32 %v1007_v62, %v1006_v59  ;;  %v998_v32 = vadd.f32 %v997_v19, %v996_v9  ;;  %v991_v33 = vadd.f32 %v990_v20, %v989_v11 }
 0x4e0   : > { %v1417_v60 = vunpack.i.h.bf16 %v1415_v3  ;;  %v1416_v5 = vunpack.i.l.bf16 %v1415_v3 }
 0x4e1   : > { %v1002_v6 = vrot.slane %v1001_v2, 2  ;;  %v1009_v12 = vrot.slane %v1008_v4, 2  ;;  %v1049_v44 = vsel %vm807_vm1, %v998_v32, %v991_v33 }
 0x4e2   : > { %v982_v7 = vmul.f32 %v1417_v60, %v1759_v27  ;;  %v981_v8 = vmul.f32 %v1416_v5, %v1759_v27 }
 0x4e3   : > { %v1003_v16 = vadd.f32 %v1002_v6, %v1001_v2  ;;  %v1010_v23 = vadd.f32 %v1009_v12, %v1008_v4 }
 0x4e4   : > { %v1020_v13 = vsel %vm764_vm0, %v982_v7, 0.0  ;;  %v1013_v15 = vsel %vm764_vm0, %v981_v8, 0.0 }
 0x4e5   : > { %v1021_v17 = vrot.slane %v1020_v13, 4  ;;  %v1014_v18 = vrot.slane %v1013_v15, 4  ;;  %v1004_v26 = vrot.slane %v1003_v16, 1  ;;  %v1011_v35 = vrot.slane %v1010_v23, 1 }
 0x4e7   : > { %v1022_v58 = vadd.f32 %v1021_v17, %v1020_v13  ;;  %v1015_v21 = vadd.f32 %v1014_v18, %v1013_v15  ;;  %v1420_v22 = vpop.permute.xlu2 %1419  ;;  %v1005_v39 = vadd.f32 %v1004_v26, %v1003_v16  ;;  %v1012_v45 = vadd.f32 %v1011_v35, %v1010_v23 }
 0x4e8   : > { %v1422_v24 = vunpack.i.h.bf16 %v1420_v22  ;;  %v1421_v25 = vunpack.i.l.bf16 %v1420_v22 }
 0x4e9   : > { %v1023_v28 = vrot.slane %v1022_v58, 2  ;;  %v1016_v29 = vrot.slane %v1015_v21, 2 }
 0x4ea   : > { %v984_v30 = vmul.f32 %v1422_v24, %v1759_v27  ;;  %v983_v31 = vmul.f32 %v1421_v25, %v1759_v27  ;;  %v1050_v27 = vsel %vm809_vm2, %v1005_v39, %v1049_v44 }
 0x4eb   : > { %v1017_v34 = vadd.f32 %v1016_v29, %v1015_v21  ;;  %v1024_v36 = vadd.f32 %v1023_v28, %v1022_v58  ;;  %v1051_v52 = vsel %vm811_vm3, %v1012_v45, %v1050_v27 }
 0x4ec   : > { %v1034_v37 = vsel %vm764_vm0, %v984_v30, 0.0  ;;  %v1027_v38 = vsel %vm764_vm0, %v983_v31, 0.0 }
 0x4ed   : > { %v1018_v40 = vrot.slane %v1017_v34, 1  ;;  %v1035_v41 = vrot.slane %v1034_v37, 4  ;;  %v1028_v42 = vrot.slane %v1027_v38, 4  ;;  %v1025_v46 = vrot.slane %v1024_v36, 1 }
 0x4ef   : > { %v1036_v43 = vadd.f32 %v1035_v41, %v1034_v37  ;;  %v1029_v10 = vadd.f32 %v1028_v42, %v1027_v38  ;;  %v1019_v47 = vadd.f32 %v1018_v40, %v1017_v34  ;;  %v1026_v53 = vadd.f32 %v1025_v46, %v1024_v36 }
 0x4f1   : > { %v1037_v48 = vrot.slane %v1036_v43, 2  ;;  %v1030_v49 = vrot.slane %v1029_v10, 2  ;;  %v1052_v54 = vsel %vm813_vm4, %v1019_v47, %v1051_v52 }
 0x4f2   : > { %v1053_v61 = vsel %vm815_vm5, %v1026_v53, %v1052_v54 }
 0x4f3   : > { %v1038_v50 = vadd.f32 %v1037_v48, %v1036_v43  ;;  %v1031_v51 = vadd.f32 %v1030_v49, %v1029_v10 }
 0x4f5   : > { %v1039_v55 = vrot.slane %v1038_v50, 1  ;;  %v1032_v56 = vrot.slane %v1031_v51, 1 }
 0x4f7   : > { %v1040_v57 = vadd.f32 %v1039_v55, %v1038_v50  ;;  %v1033_v59 = vadd.f32 %v1032_v56, %v1031_v51 }
 0x4f9   : > { %v1054_v62 = vsel %vm817_vm6, %v1033_v59, %v1053_v61 }
 0x4fa   : > { %v1055_v63 = vsel %vm819_vm7, %v1040_v57, %v1054_v62 }
 0x4fb   : > { %v1057_v0 = vmul.f32 %v1055_v63, %v1745_v14 }
 0x4fd   : > { %v1058_v1 = vmax.f32 %v1057_v0, 0.0 }
 0x4ff   : > { %v1059_v2 = vmin.f32 %v1058_v1, 1.0 }
 0x501   : > { %1060 = vst.msk [vmem:[#allocation6] sm:$0xff] %vm764_vm0, %v1059_v2 }
 0x502 PF: > { %p1340_p2 = scmp.eq.s32.totalorder %s1151_s24, 1  ;;  %s1071_s12 = sshll.u32 %s1875_s5, 4  ;;  %s1072_s12 = int_to_ptr.hbm [resolvable:$true] %s1071_s12 }
 0x503   : > { %s1546_s13 = smov [#allocation6]  }
 0x504   : > { %s1069_s14 = sshll.u32 %s1546_s13, 4  ;;  %s1070_s14 = int_to_ptr.vmem [resolvable:$true] %s1069_s14 }
 0x505   : > { %1332 = dma.vmem_to_hbm [thread:$0]  (%p1340_p2), %s1070_s14, 128, %s1072_s12, [#allocation5]  }
 0x506   : > { %1514 = dma.done.wait (%p1340_p2), [#allocation5], 128  }
 0x507   : > { %1516 = vsyncadd (%p1340_p2), [#allocation5], 4294967168 }
 0x508 PF: > { %s19_s23 = sadd.s32 1, %s1539_s23   ;;  %s1878_s18 = smov %s1523_s19 }
 0x509   : > { %p16_p3 = scmp.ge.s32.totalorder %s19_s23, 4   ;;  %s1879_s19 = smov %s1527_s20 }
 0x50a   : > { %s1880_s20 = smov %s1628_s30  ;;  %s1881_s21 = smov %s1535_s22 }
 0x50b   : > { %s1882_s22 = smov %s1884_s25  ;;  %18 = sbr.rel (!%p16_p3) target bundleno = 5 (0x5), region = 89 }
 0x510   :  { %1085 = vsyncpa [#allocation4], 1 }
 0x511   :  { %1087 = vsyncpa [#allocation4 + $0x1], 1 }
 0x512   :  { %1088 = vsyncpa [#allocation5], 1 }
 0x513   :  { %1090 = vsyncpa [#allocation5 + $0x1], 1 }

</bundles_post_ra>
